<compile_context>
chip_gen: v7x
topology: tpu7x:2x2x1
jax: 0.10.0
libtpu: 0.0.40
codegen_flags: <defaults>
</compile_context>

<pallas_src>
import math

import jax
import jax.numpy as jnp
from jax import lax
from jax.experimental import pallas as pl
from jax.experimental.pallas import tpu as pltpu

_SUBLANE = 16  # bf16 packs 16 rows per (16, 128) sublane tile


def _pair_rel_kernel(x_ref, y_ref, rid_ref, mask_ref,
                     w_top_ref, w_bot_ref, b_ref, rel_ref, out_ref):
    # [x ; y] @ W^T  ==  x @ W_top + y @ W_bot  (bf16 operands, f32 MXU accum),
    # without ever materializing the concat in HBM.
    h = jnp.dot(x_ref[...], w_top_ref[...], preferred_element_type=jnp.float32)
    h = h + jnp.dot(y_ref[...], w_bot_ref[...],
                    preferred_element_type=jnp.float32)
    h = h + b_ref[...]                                     # (tile_n, H) f32

    # Exact (erf-based) GELU, matching BERT's ACT2FN["gelu"], in f32.
    h = 0.5 * h * (1.0 + lax.erf(h * jnp.float32(1.0 / math.sqrt(2.0))))

    # Scores against ALL relations in one small MXU matmul (contract hidden
    # dim of both operands -> transposed-RHS / q@k^T pattern):
    #   (num_rel, tile_n) = rel (num_rel, H) . h (tile_n, H)^T
    scores_t = jnp.einsum("rh,nh->rn", rel_ref[...], h.astype(rel_ref.dtype),
                          preferred_element_type=jnp.float32)

    # Per-row relation pick: compare a sublane iota against the lane-dense
    # relation ids and reduce the (small) num_rel sublane axis.
    rid = rid_ref[0]                                       # (1, tile_n) int32
    row_ids = lax.broadcasted_iota(jnp.int32, scores_t.shape, 0)
    score = jnp.sum(jnp.where(row_ids == rid, scores_t, 0.0),
                    axis=0, keepdims=True)                 # (1, tile_n) f32

    z = score * mask_ref[0]                                # (1, tile_n)
    # -logsigmoid(z) = softplus(-z) = max(-z, 0) + log1p(exp(-|z|))  (stable)
    res = jnp.maximum(-z, 0.0) + jnp.log1p(jnp.exp(-jnp.abs(z)))
    out_ref[...] = res[None]                               # lane-dense store


def prepare_params(dense_w, dense_b, rel_emb):
    """One-time parameter layout (hoisted out of the per-call path).
    dense_w: (H, 2H) nn.Linear weight; dense_b: (H,); rel_emb: (num_rel, H).
    Splits the transposed dense weight into the halves applied to pair_x and
    pair_y and casts the MXU operands to bf16 (f32 accumulation in-kernel)."""
    H = dense_b.shape[0]
    w_t = dense_w.T                                        # (2H, H)
    w_top = w_t[:H, :].astype(jnp.bfloat16)                # applied to pair_x
    w_bot = w_t[H:, :].astype(jnp.bfloat16)                # applied to pair_y
    bias = dense_b.reshape(1, H).astype(jnp.float32)
    rel = rel_emb.astype(jnp.bfloat16)
    return w_top, w_bot, bias, rel


def _round_up(x, m):
    return (x + m - 1) // m * m


def _default_vmem_limit():
    # Use most of the chip's VMEM: ~96 MiB on v5e/v6e (128 MiB physical),
    # ~48 MiB on v7x (64 MiB physical).
    try:
        cap = pltpu.get_tpu_info().vmem_capacity_bytes
    except Exception:
        cap = 64 * 1024 * 1024                             # conservative fallback
    return int(min(100 * 1024 * 1024, cap * 3 // 4))


def bert_pretraining_pair_rel(pair_x, pair_y, pair_r, pair_pos_neg_mask,
                              w_top, w_bot, bias, rel_emb, *, tile_n=512):
    """pair_x, pair_y: (B, P, H); pair_r: (B, P) int; pair_pos_neg_mask: (B, P);
    w_top / w_bot: (H, H) bf16; bias: (1, H) f32; rel_emb: (num_rel, H) bf16.
    Returns (B, P) f32 = -logsigmoid(score * mask)."""
    B, P, H = pair_x.shape
    N = B * P
    num_rel = rel_emb.shape[0]

    # Row-tile selection: multiple of 16 (bf16 sublanes), no bigger than the
    # problem, and small enough that the grid keeps >= 2 steps when there is
    # enough work (so "parallel" actually shards across v7x's 2 TensorCores).
    tile_n = max(_SUBLANE, _round_up(min(tile_n, N), _SUBLANE))
    if N > 2 * _SUBLANE:
        tile_n = min(tile_n, _round_up(pl.cdiv(N, 2), _SUBLANE))
    n_pad = _round_up(N, tile_n)
    grid_n = n_pad // tile_n
    pad = n_pad - N

    x = pair_x.reshape(N, H).astype(jnp.bfloat16)
    y = pair_y.reshape(N, H).astype(jnp.bfloat16)
    rid = pair_r.reshape(N).astype(jnp.int32)
    mask = pair_pos_neg_mask.reshape(N).astype(jnp.float32)
    if pad:
        x = jnp.pad(x, ((0, pad), (0, 0)))
        y = jnp.pad(y, ((0, pad), (0, 0)))
        rid = jnp.pad(rid, (0, pad))           # 0 is a valid relation id
        mask = jnp.pad(mask, (0, pad))
    # Lane-dense layout for the per-row scalars and the output.
    rid = rid.reshape(grid_n, 1, tile_n)
    mask = mask.reshape(grid_n, 1, tile_n)

    vmem_limit = _default_vmem_limit()

    def build(single_buffer_residents):
        res = (dict(pipeline_mode=pl.Buffered(1))
               if single_buffer_residents else {})
        row2 = lambda i: (i, 0)
        row3 = lambda i: (i, 0, 0)
        const2 = lambda i: (0, 0)
        return pl.pallas_call(
            _pair_rel_kernel,
            out_shape=jax.ShapeDtypeStruct((grid_n, 1, tile_n), jnp.float32),
            grid=(grid_n,),
            in_specs=[
                pl.BlockSpec((tile_n, H), row2),              # pair_x tile (bf16)
                pl.BlockSpec((tile_n, H), row2),              # pair_y tile (bf16)
                pl.BlockSpec((1, 1, tile_n), row3),           # pair_r (lane-dense)
                pl.BlockSpec((1, 1, tile_n), row3),           # mask   (lane-dense)
                pl.BlockSpec((H, H), const2, **res),          # W_top (resident)
                pl.BlockSpec((H, H), const2, **res),          # W_bot (resident)
                pl.BlockSpec((1, H), const2, **res),          # bias  (resident)
                pl.BlockSpec((num_rel, H), const2, **res),    # rel_emb (resident)
            ],
            out_specs=pl.BlockSpec((1, 1, tile_n), row3),     # lane-dense output
            compiler_params=pltpu.CompilerParams(
                dimension_semantics=("parallel",),
                vmem_limit_bytes=vmem_limit,
            ),
        )

    args = (x, y, rid, mask, w_top, w_bot, bias, rel_emb)
    try:
        out = build(True)(*args)
        jax.block_until_ready(out)
    except Exception:
        # Fallback for Pallas builds without single-buffer pipeline_mode support.
        out = build(False)(*args)

    return out.reshape(n_pad)[:N].reshape(B, P)


if __name__ == "__main__":
    # Small shapes consistent with the module's forward; multi-tile grid.
    batch, num_pair, hidden, num_rel = 2, 64, 32, 4

    key = jax.random.PRNGKey(0)
    k_x, k_y, k_r, k_m, k_w, k_b, k_e = jax.random.split(key, 7)

    pair_x = jax.random.normal(k_x, (batch, num_pair, hidden), jnp.float32)
    pair_y = jax.random.normal(k_y, (batch, num_pair, hidden), jnp.float32)
    pair_r = jax.random.randint(k_r, (batch, num_pair), 0, num_rel, jnp.int32)
    pair_pos_neg_mask = jnp.where(
        jax.random.bernoulli(k_m, 0.5, (batch, num_pair)), 1.0, -1.0
    ).astype(jnp.float32)

    # Parameters: nn.Linear(2H, H) + nn.Embedding(num_rel, H) shapes.
    bound = 1.0 / math.sqrt(2 * hidden)
    dense_w = jax.random.uniform(k_w, (hidden, 2 * hidden), jnp.float32,
                                 -bound, bound)
    dense_b = jax.random.uniform(k_b, (hidden,), jnp.float32, -bound, bound)
    rel_emb = jax.random.normal(k_e, (num_rel, hidden), jnp.float32)

    w_top, w_bot, bias, rel_bf = prepare_params(dense_w, dense_b, rel_emb)

    out = bert_pretraining_pair_rel(pair_x, pair_y, pair_r, pair_pos_neg_mask,
                                    w_top, w_bot, bias, rel_bf)
    jax.block_until_ready(out)

    # Reference 1: exact module semantics in pure f32 (PyTorch forward).
    cat = jnp.concatenate([pair_x, pair_y], axis=-1)
    h32 = cat @ dense_w.T + dense_b
    h32 = 0.5 * h32 * (1.0 + lax.erf(h32 / jnp.sqrt(2.0)))
    score32 = jnp.sum(h32 * rel_emb[pair_r], axis=-1)
    ref32 = -jax.nn.log_sigmoid(score32 * pair_pos_neg_mask)

    # Reference 2: same math at the kernel's precision (bf16 matmul operands,
    # f32 accumulation) -- tight check of the kernel logic itself.
    xb = pair_x.reshape(-1, hidden).astype(jnp.bfloat16)
    yb = pair_y.reshape(-1, hidden).astype(jnp.bfloat16)
    hm = (jnp.dot(xb, w_top, preferred_element_type=jnp.float32)
          + jnp.dot(yb, w_bot, preferred_element_type=jnp.float32)
          + bias)
    hm = 0.5 * hm * (1.0 + lax.erf(hm / jnp.sqrt(2.0)))
    sm = jnp.einsum("nh,rh->nr", hm.astype(jnp.bfloat16), rel_bf,
                    preferred_element_type=jnp.float32)
    sm = jnp.take_along_axis(sm, pair_r.reshape(-1, 1), axis=1)[:, 0]
    zm = sm.reshape(batch, num_pair) * pair_pos_neg_mask
    refm = jnp.maximum(-zm, 0.0) + jnp.log1p(jnp.exp(-jnp.abs(zm)))

    assert out.shape == ref32.shape
    # Tight vs matched-precision reference (validates kernel logic).
    assert jnp.allclose(out, refm, atol=1e-2, rtol=1e-2)
    # Loose vs pure-f32 module semantics (bf16 matmul inputs -> ~1e-2 noise).
    assert jnp.allclose(out, ref32, atol=1e-1, rtol=1e-1)

    print("KERNEL_OK")
</pallas_src>

<mosaic_0001>
module attributes {stable_mosaic.version = 11 : i64} {
  func.func @_pair_rel_kernel(%arg0: i32, %arg1: memref<64x32xbf16, #tpu.memory_space<vmem>>, %arg2: memref<64x32xbf16, #tpu.memory_space<vmem>>, %arg3: memref<1x1x64xi32, #tpu.memory_space<vmem>>, %arg4: memref<1x1x64xf32, #tpu.memory_space<vmem>>, %arg5: memref<32x32xbf16, #tpu.memory_space<vmem>>, %arg6: memref<32x32xbf16, #tpu.memory_space<vmem>>, %arg7: memref<1x32xf32, #tpu.memory_space<vmem>>, %arg8: memref<4x32xbf16, #tpu.memory_space<vmem>>, %arg9: memref<1x1x64xf32, #tpu.memory_space<vmem>>) attributes {dimension_semantics = [#tpu.dimension_semantics<parallel>], iteration_bounds = array<i64: 2>, scalar_prefetch = 0 : i64, scratch_operands = 0 : i64, tpu.core_type = #tpu.core_type<tc>, window_params = [{transform_indices = @transform_0, window_bounds = array<i64: 64, 32>}, {transform_indices = @transform_1, window_bounds = array<i64: 64, 32>}, {transform_indices = @transform_2, window_bounds = array<i64: 1, 1, 64>}, {transform_indices = @transform_3, window_bounds = array<i64: 1, 1, 64>}, {pipeline_mode = #tpu.pipeline_mode<synchronous>, transform_indices = @transform_4, window_bounds = array<i64: 32, 32>}, {pipeline_mode = #tpu.pipeline_mode<synchronous>, transform_indices = @transform_5, window_bounds = array<i64: 32, 32>}, {pipeline_mode = #tpu.pipeline_mode<synchronous>, transform_indices = @transform_6, window_bounds = array<i64: 1, 32>}, {pipeline_mode = #tpu.pipeline_mode<synchronous>, transform_indices = @transform_7, window_bounds = array<i64: 4, 32>}, {transform_indices = @transform_8, window_bounds = array<i64: 1, 1, 64>}]} {
    %c0 = arith.constant 0 : index
    %c0_0 = arith.constant 0 : index
    %0 = vector.load %arg1[%c0, %c0_0] : memref<64x32xbf16, #tpu.memory_space<vmem>>, vector<64x32xbf16>
    %c0_1 = arith.constant 0 : index
    %c0_2 = arith.constant 0 : index
    %1 = vector.load %arg5[%c0_1, %c0_2] : memref<32x32xbf16, #tpu.memory_space<vmem>>, vector<32x32xbf16>
    %cst = arith.constant dense<0.000000e+00> : vector<64x32xf32>
    %2 = tpu.matmul %0, %1, %cst {dimension_numbers = #tpu.dot_dimension_numbers<[1], [0], [0], [1], [0, 0, 1, 1], [], []>} : vector<64x32xbf16>, vector<32x32xbf16>, vector<64x32xf32> -> vector<64x32xf32>
    %c0_3 = arith.constant 0 : index
    %c0_4 = arith.constant 0 : index
    %3 = vector.load %arg2[%c0_3, %c0_4] : memref<64x32xbf16, #tpu.memory_space<vmem>>, vector<64x32xbf16>
    %c0_5 = arith.constant 0 : index
    %c0_6 = arith.constant 0 : index
    %4 = vector.load %arg6[%c0_5, %c0_6] : memref<32x32xbf16, #tpu.memory_space<vmem>>, vector<32x32xbf16>
    %cst_7 = arith.constant dense<0.000000e+00> : vector<64x32xf32>
    %5 = tpu.matmul %3, %4, %cst_7 {dimension_numbers = #tpu.dot_dimension_numbers<[1], [0], [0], [1], [0, 0, 1, 1], [], []>} : vector<64x32xbf16>, vector<32x32xbf16>, vector<64x32xf32> -> vector<64x32xf32>
    %6 = arith.addf %2, %5 : vector<64x32xf32>
    %c0_8 = arith.constant 0 : index
    %c0_9 = arith.constant 0 : index
    %7 = vector.load %arg7[%c0_8, %c0_9] : memref<1x32xf32, #tpu.memory_space<vmem>>, vector<1x32xf32>
    %8 = vector.broadcast %7 : vector<1x32xf32> to vector<64x32xf32>
    %9 = arith.addf %6, %8 : vector<64x32xf32>
    %cst_10 = arith.constant 5.000000e-01 : f32
    %10 = vector.broadcast %cst_10 : f32 to vector<64x32xf32>
    %11 = arith.mulf %10, %9 : vector<64x32xf32>
    %cst_11 = arith.constant 0.707106769 : f32
    %12 = vector.broadcast %cst_11 : f32 to vector<64x32xf32>
    %13 = arith.mulf %9, %12 : vector<64x32xf32>
    %14 = math.erf %13 : vector<64x32xf32>
    %cst_12 = arith.constant 1.000000e+00 : f32
    %15 = vector.broadcast %cst_12 : f32 to vector<64x32xf32>
    %16 = arith.addf %15, %14 : vector<64x32xf32>
    %17 = arith.mulf %11, %16 : vector<64x32xf32>
    %c0_13 = arith.constant 0 : index
    %c0_14 = arith.constant 0 : index
    %18 = vector.load %arg8[%c0_13, %c0_14] : memref<4x32xbf16, #tpu.memory_space<vmem>>, vector<4x32xbf16>
    %19 = arith.truncf %17 : vector<64x32xf32> to vector<64x32xbf16>
    "tpu.trace_start"() <{level = 10 : i32, message = "rh,nh->rn"}> : () -> ()
    %cst_15 = arith.constant dense<0.000000e+00> : vector<4x64xf32>
    %20 = tpu.matmul %18, %19, %cst_15 {dimension_numbers = #tpu.dot_dimension_numbers<[1], [1], [0], [0], [0, 0, 1, 0], [], []>} : vector<4x32xbf16>, vector<64x32xbf16>, vector<4x64xf32> -> vector<4x64xf32>
    "tpu.trace_stop"() : () -> ()
    %c0_16 = arith.constant 0 : index
    %c0_17 = arith.constant 0 : index
    %c0_18 = arith.constant 0 : index
    %21 = vector.load %arg3[%c0_16, %c0_17, %c0_18] : memref<1x1x64xi32, #tpu.memory_space<vmem>>, vector<1x1x64xi32>
    %22 = vector.shape_cast %21 : vector<1x1x64xi32> to vector<1x64xi32>
    %23 = tpu.iota {dimensions = array<i32: 0>} : vector<4x64xi32>
    %24 = vector.broadcast %22 : vector<1x64xi32> to vector<4x64xi32>
    %25 = arith.cmpi eq, %23, %24 : vector<4x64xi32>
    %cst_19 = arith.constant 0.000000e+00 : f32
    %26 = vector.broadcast %cst_19 : f32 to vector<4x64xf32>
    %27 = arith.select %25, %20, %26 : vector<4x64xi1>, vector<4x64xf32>
    %cst_20 = arith.constant dense<0.000000e+00> : vector<64xf32>
    %28 = vector.multi_reduction <add>, %27, %cst_20 [0] : vector<4x64xf32> to vector<64xf32>
    %29 = vector.shape_cast %28 : vector<64xf32> to vector<1x64xf32>
    %c0_21 = arith.constant 0 : index
    %c0_22 = arith.constant 0 : index
    %c0_23 = arith.constant 0 : index
    %30 = vector.load %arg4[%c0_21, %c0_22, %c0_23] : memref<1x1x64xf32, #tpu.memory_space<vmem>>, vector<1x1x64xf32>
    %31 = vector.shape_cast %30 : vector<1x1x64xf32> to vector<1x64xf32>
    %32 = arith.mulf %29, %31 : vector<1x64xf32>
    %cst_24 = arith.constant 0.000000e+00 : f32
    %33 = vector.broadcast %cst_24 : f32 to vector<1x64xf32>
    %34 = arith.subf %33, %32 : vector<1x64xf32>
    %cst_25 = arith.constant 0.000000e+00 : f32
    %35 = vector.broadcast %cst_25 : f32 to vector<1x64xf32>
    %36 = arith.maximumf %34, %35 : vector<1x64xf32>
    %37 = math.absf %32 : vector<1x64xf32>
    %cst_26 = arith.constant 0.000000e+00 : f32
    %38 = vector.broadcast %cst_26 : f32 to vector<1x64xf32>
    %39 = arith.subf %38, %37 : vector<1x64xf32>
    %40 = math.exp %39 : vector<1x64xf32>
    %41 = math.log1p %40 : vector<1x64xf32>
    %42 = arith.addf %36, %41 : vector<1x64xf32>
    %43 = vector.shape_cast %42 : vector<1x64xf32> to vector<1x1x64xf32>
    %c0_27 = arith.constant 0 : index
    %c0_28 = arith.constant 0 : index
    %c0_29 = arith.constant 0 : index
    %44 = vector.load %arg9[%c0_27, %c0_28, %c0_29] : memref<1x1x64xf32, #tpu.memory_space<vmem>>, vector<1x1x64xf32>
    tpu.vector_store %arg9[%c0_27, %c0_28, %c0_29], %43 {strides = array<i32>} : memref<1x1x64xf32, #tpu.memory_space<vmem>>, vector<1x1x64xf32>,
    return
  }
  func.func @transform_0(%arg0: i32) -> (i32, i32) {
    %c0_i32 = arith.constant 0 : i32
    %c0_i32_0 = arith.constant 0 : i32
    return %arg0, %c0_i32 : i32, i32
  }
  func.func @transform_1(%arg0: i32) -> (i32, i32) {
    %c0_i32 = arith.constant 0 : i32
    %c0_i32_0 = arith.constant 0 : i32
    return %arg0, %c0_i32 : i32, i32
  }
  func.func @transform_2(%arg0: i32) -> (i32, i32, i32) {
    %c0_i32 = arith.constant 0 : i32
    %c0_i32_0 = arith.constant 0 : i32
    %c0_i32_1 = arith.constant 0 : i32
    return %arg0, %c0_i32, %c0_i32_0 : i32, i32, i32
  }
  func.func @transform_3(%arg0: i32) -> (i32, i32, i32) {
    %c0_i32 = arith.constant 0 : i32
    %c0_i32_0 = arith.constant 0 : i32
    %c0_i32_1 = arith.constant 0 : i32
    return %arg0, %c0_i32, %c0_i32_0 : i32, i32, i32
  }
  func.func @transform_4(%arg0: i32) -> (i32, i32) {
    %c0_i32 = arith.constant 0 : i32
    %c0_i32_0 = arith.constant 0 : i32
    %c0_i32_1 = arith.constant 0 : i32
    return %c0_i32, %c0_i32_0 : i32, i32
  }
  func.func @transform_5(%arg0: i32) -> (i32, i32) {
    %c0_i32 = arith.constant 0 : i32
    %c0_i32_0 = arith.constant 0 : i32
    %c0_i32_1 = arith.constant 0 : i32
    return %c0_i32, %c0_i32_0 : i32, i32
  }
  func.func @transform_6(%arg0: i32) -> (i32, i32) {
    %c0_i32 = arith.constant 0 : i32
    %c0_i32_0 = arith.constant 0 : i32
    %c0_i32_1 = arith.constant 0 : i32
    return %c0_i32, %c0_i32_0 : i32, i32
  }
  func.func @transform_7(%arg0: i32) -> (i32, i32) {
    %c0_i32 = arith.constant 0 : i32
    %c0_i32_0 = arith.constant 0 : i32
    %c0_i32_1 = arith.constant 0 : i32
    return %c0_i32, %c0_i32_0 : i32, i32
  }
  func.func @transform_8(%arg0: i32) -> (i32, i32, i32) {
    %c0_i32 = arith.constant 0 : i32
    %c0_i32_0 = arith.constant 0 : i32
    %c0_i32_1 = arith.constant 0 : i32
    return %arg0, %c0_i32, %c0_i32_0 : i32, i32, i32
  }
}

module attributes {stable_mosaic.version = 11 : i64} {
  func.func @_pair_rel_kernel(%arg0: i32, %arg1: memref<64x32xbf16, #tpu.memory_space<vmem>>, %arg2: memref<64x32xbf16, #tpu.memory_space<vmem>>, %arg3: memref<1x1x64xi32, #tpu.memory_space<vmem>>, %arg4: memref<1x1x64xf32, #tpu.memory_space<vmem>>, %arg5: memref<32x32xbf16, #tpu.memory_space<vmem>>, %arg6: memref<32x32xbf16, #tpu.memory_space<vmem>>, %arg7: memref<1x32xf32, #tpu.memory_space<vmem>>, %arg8: memref<4x32xbf16, #tpu.memory_space<vmem>>, %arg9: memref<1x1x64xf32, #tpu.memory_space<vmem>>) attributes {dimension_semantics = [#tpu.dimension_semantics<parallel>], iteration_bounds = array<i64: 2>, scalar_prefetch = 0 : i64, scratch_operands = 0 : i64, tpu.core_type = #tpu.core_type<tc>, window_params = [{transform_indices = @transform_0, window_bounds = array<i64: 64, 32>}, {transform_indices = @transform_1, window_bounds = array<i64: 64, 32>}, {transform_indices = @transform_2, window_bounds = array<i64: 1, 1, 64>}, {transform_indices = @transform_3, window_bounds = array<i64: 1, 1, 64>}, {pipeline_mode = #tpu.pipeline_mode<synchronous>, transform_indices = @transform_4, window_bounds = array<i64: 32, 32>}, {pipeline_mode = #tpu.pipeline_mode<synchronous>, transform_indices = @transform_5, window_bounds = array<i64: 32, 32>}, {pipeline_mode = #tpu.pipeline_mode<synchronous>, transform_indices = @transform_6, window_bounds = array<i64: 1, 32>}, {pipeline_mode = #tpu.pipeline_mode<synchronous>, transform_indices = @transform_7, window_bounds = array<i64: 4, 32>}, {transform_indices = @transform_8, window_bounds = array<i64: 1, 1, 64>}]} {
    %c0 = arith.constant 0 : index
    %c0_0 = arith.constant 0 : index
    %0 = vector.load %arg1[%c0, %c0_0] : memref<64x32xbf16, #tpu.memory_space<vmem>>, vector<64x32xbf16>
    %c0_1 = arith.constant 0 : index
    %c0_2 = arith.constant 0 : index
    %1 = vector.load %arg5[%c0_1, %c0_2] : memref<32x32xbf16, #tpu.memory_space<vmem>>, vector<32x32xbf16>
    %cst = arith.constant dense<0.000000e+00> : vector<64x32xf32>
    %2 = tpu.matmul %0, %1, %cst {dimension_numbers = #tpu.dot_dimension_numbers<[1], [0], [0], [1], [0, 0, 1, 1], [], []>} : vector<64x32xbf16>, vector<32x32xbf16>, vector<64x32xf32> -> vector<64x32xf32>
    %c0_3 = arith.constant 0 : index
    %c0_4 = arith.constant 0 : index
    %3 = vector.load %arg2[%c0_3, %c0_4] : memref<64x32xbf16, #tpu.memory_space<vmem>>, vector<64x32xbf16>
    %c0_5 = arith.constant 0 : index
    %c0_6 = arith.constant 0 : index
    %4 = vector.load %arg6[%c0_5, %c0_6] : memref<32x32xbf16, #tpu.memory_space<vmem>>, vector<32x32xbf16>
    %cst_7 = arith.constant dense<0.000000e+00> : vector<64x32xf32>
    %5 = tpu.matmul %3, %4, %cst_7 {dimension_numbers = #tpu.dot_dimension_numbers<[1], [0], [0], [1], [0, 0, 1, 1], [], []>} : vector<64x32xbf16>, vector<32x32xbf16>, vector<64x32xf32> -> vector<64x32xf32>
    %6 = arith.addf %2, %5 : vector<64x32xf32>
    %c0_8 = arith.constant 0 : index
    %c0_9 = arith.constant 0 : index
    %7 = vector.load %arg7[%c0_8, %c0_9] : memref<1x32xf32, #tpu.memory_space<vmem>>, vector<1x32xf32>
    %8 = vector.broadcast %7 : vector<1x32xf32> to vector<64x32xf32>
    %9 = arith.addf %6, %8 : vector<64x32xf32>
    %cst_10 = arith.constant 5.000000e-01 : f32
    %10 = vector.broadcast %cst_10 : f32 to vector<64x32xf32>
    %11 = arith.mulf %10, %9 : vector<64x32xf32>
    %cst_11 = arith.constant 0.707106769 : f32
    %12 = vector.broadcast %cst_11 : f32 to vector<64x32xf32>
    %13 = arith.mulf %9, %12 : vector<64x32xf32>
    %14 = math.erf %13 : vector<64x32xf32>
    %cst_12 = arith.constant 1.000000e+00 : f32
    %15 = vector.broadcast %cst_12 : f32 to vector<64x32xf32>
    %16 = arith.addf %15, %14 : vector<64x32xf32>
    %17 = arith.mulf %11, %16 : vector<64x32xf32>
    %c0_13 = arith.constant 0 : index
    %c0_14 = arith.constant 0 : index
    %18 = vector.load %arg8[%c0_13, %c0_14] : memref<4x32xbf16, #tpu.memory_space<vmem>>, vector<4x32xbf16>
    %19 = arith.truncf %17 : vector<64x32xf32> to vector<64x32xbf16>
    "tpu.trace_start"() <{level = 10 : i32, message = "rh,nh->rn"}> : () -> ()
    %cst_15 = arith.constant dense<0.000000e+00> : vector<4x64xf32>
    %20 = tpu.matmul %18, %19, %cst_15 {dimension_numbers = #tpu.dot_dimension_numbers<[1], [1], [0], [0], [0, 0, 1, 0], [], []>} : vector<4x32xbf16>, vector<64x32xbf16>, vector<4x64xf32> -> vector<4x64xf32>
    "tpu.trace_stop"() : () -> ()
    %c0_16 = arith.constant 0 : index
    %c0_17 = arith.constant 0 : index
    %c0_18 = arith.constant 0 : index
    %21 = vector.load %arg3[%c0_16, %c0_17, %c0_18] : memref<1x1x64xi32, #tpu.memory_space<vmem>>, vector<1x1x64xi32>
    %22 = vector.shape_cast %21 : vector<1x1x64xi32> to vector<1x64xi32>
    %23 = tpu.iota {dimensions = array<i32: 0>} : vector<4x64xi32>
    %24 = vector.broadcast %22 : vector<1x64xi32> to vector<4x64xi32>
    %25 = arith.cmpi eq, %23, %24 : vector<4x64xi32>
    %cst_19 = arith.constant 0.000000e+00 : f32
    %26 = vector.broadcast %cst_19 : f32 to vector<4x64xf32>
    %27 = arith.select %25, %20, %26 : vector<4x64xi1>, vector<4x64xf32>
    %cst_20 = arith.constant dense<0.000000e+00> : vector<64xf32>
    %28 = vector.multi_reduction <add>, %27, %cst_20 [0] : vector<4x64xf32> to vector<64xf32>
    %29 = vector.shape_cast %28 : vector<64xf32> to vector<1x64xf32>
    %c0_21 = arith.constant 0 : index
    %c0_22 = arith.constant 0 : index
    %c0_23 = arith.constant 0 : index
    %30 = vector.load %arg4[%c0_21, %c0_22, %c0_23] : memref<1x1x64xf32, #tpu.memory_space<vmem>>, vector<1x1x64xf32>
    %31 = vector.shape_cast %30 : vector<1x1x64xf32> to vector<1x64xf32>
    %32 = arith.mulf %29, %31 : vector<1x64xf32>
    %cst_24 = arith.constant 0.000000e+00 : f32
    %33 = vector.broadcast %cst_24 : f32 to vector<1x64xf32>
    %34 = arith.subf %33, %32 : vector<1x64xf32>
    %cst_25 = arith.constant 0.000000e+00 : f32
    %35 = vector.broadcast %cst_25 : f32 to vector<1x64xf32>
    %36 = arith.maximumf %34, %35 : vector<1x64xf32>
    %37 = math.absf %32 : vector<1x64xf32>
    %cst_26 = arith.constant 0.000000e+00 : f32
    %38 = vector.broadcast %cst_26 : f32 to vector<1x64xf32>
    %39 = arith.subf %38, %37 : vector<1x64xf32>
    %40 = math.exp %39 : vector<1x64xf32>
    %41 = math.log1p %40 : vector<1x64xf32>
    %42 = arith.addf %36, %41 : vector<1x64xf32>
    %43 = vector.shape_cast %42 : vector<1x64xf32> to vector<1x1x64xf32>
    %c0_27 = arith.constant 0 : index
    %c0_28 = arith.constant 0 : index
    %c0_29 = arith.constant 0 : index
    %44 = vector.load %arg9[%c0_27, %c0_28, %c0_29] : memref<1x1x64xf32, #tpu.memory_space<vmem>>, vector<1x1x64xf32>
    tpu.vector_store %arg9[%c0_27, %c0_28, %c0_29], %43 {strides = array<i32>} : memref<1x1x64xf32, #tpu.memory_space<vmem>>, vector<1x1x64xf32>,
    return
  }
  func.func @transform_0(%arg0: i32) -> (i32, i32) {
    %c0_i32 = arith.constant 0 : i32
    %c0_i32_0 = arith.constant 0 : i32
    return %arg0, %c0_i32 : i32, i32
  }
  func.func @transform_1(%arg0: i32) -> (i32, i32) {
    %c0_i32 = arith.constant 0 : i32
    %c0_i32_0 = arith.constant 0 : i32
    return %arg0, %c0_i32 : i32, i32
  }
  func.func @transform_2(%arg0: i32) -> (i32, i32, i32) {
    %c0_i32 = arith.constant 0 : i32
    %c0_i32_0 = arith.constant 0 : i32
    %c0_i32_1 = arith.constant 0 : i32
    return %arg0, %c0_i32, %c0_i32_0 : i32, i32, i32
  }
  func.func @transform_3(%arg0: i32) -> (i32, i32, i32) {
    %c0_i32 = arith.constant 0 : i32
    %c0_i32_0 = arith.constant 0 : i32
    %c0_i32_1 = arith.constant 0 : i32
    return %arg0, %c0_i32, %c0_i32_0 : i32, i32, i32
  }
  func.func @transform_4(%arg0: i32) -> (i32, i32) {
    %c0_i32 = arith.constant 0 : i32
    %c0_i32_0 = arith.constant 0 : i32
    %c0_i32_1 = arith.constant 0 : i32
    return %c0_i32, %c0_i32_0 : i32, i32
  }
  func.func @transform_5(%arg0: i32) -> (i32, i32) {
    %c0_i32 = arith.constant 0 : i32
    %c0_i32_0 = arith.constant 0 : i32
    %c0_i32_1 = arith.constant 0 : i32
    return %c0_i32, %c0_i32_0 : i32, i32
  }
  func.func @transform_6(%arg0: i32) -> (i32, i32) {
    %c0_i32 = arith.constant 0 : i32
    %c0_i32_0 = arith.constant 0 : i32
    %c0_i32_1 = arith.constant 0 : i32
    return %c0_i32, %c0_i32_0 : i32, i32
  }
  func.func @transform_7(%arg0: i32) -> (i32, i32) {
    %c0_i32 = arith.constant 0 : i32
    %c0_i32_0 = arith.constant 0 : i32
    %c0_i32_1 = arith.constant 0 : i32
    return %c0_i32, %c0_i32_0 : i32, i32
  }
  func.func @transform_8(%arg0: i32) -> (i32, i32, i32) {
    %c0_i32 = arith.constant 0 : i32
    %c0_i32_0 = arith.constant 0 : i32
    %c0_i32_1 = arith.constant 0 : i32
    return %arg0, %c0_i32, %c0_i32_0 : i32, i32, i32
  }
}

</mosaic_0001>

<bundles_post_ra>
// kernel: tpu_custom_call.1
= control target key start
LH: loop header
LB: loop body
LE: loop exit
PB: predicated region body
PF: predicated region fallthrough
CT: control target
= control target key end

     0   :  { %13 = vsyncpa [#allocation3], 0  ;;  %s1275_s0 = inlined_call_operand.vmem [shape: bf16[128,32], index: 0, kind: input, shape index: {}]   ;;  %s1276_s1 = inlined_call_operand.vmem [shape: bf16[128,32], index: 1, kind: input, shape index: {}]   ;;  %s1277_s2 = inlined_call_operand.vmem [shape: s32[2,1,64], index: 2, kind: input, shape index: {}]   ;;  %s1278_s3 = inlined_call_operand.vmem [shape: f32[2,1,64], index: 3, kind: input, shape index: {}]   ;;  %s1279_s4 = inlined_call_operand.vmem [shape: bf16[32,32], index: 4, kind: input, shape index: {}]   ;;  %s1280_s5 = inlined_call_operand.vmem [shape: bf16[32,32], index: 5, kind: input, shape index: {}]   ;;  %s1281_s6 = inlined_call_operand.vmem [shape: f32[1,32], index: 6, kind: input, shape index: {}]   ;;  %s1282_s7 = inlined_call_operand.vmem [shape: bf16[4,32], index: 7, kind: input, shape index: {}]   ;;  %s1283_s8 = inlined_call_operand.hbm [shape: f32[2,1,64], index: 8, kind: output, shape index: {}]  }
   0x1   :  { %15 = vsyncpa [#allocation3 + $0x1], 0  ;;  %s1129_s27 = smov 0   ;;  %s1131_s28 = smov 0  }
   0x2   :  { %s1133_s29 = smov 0   ;;  %s1135_s30 = smov 0  }
   0x3 LB: > { %s1150_s9 = sadd.s32 4294967295, %s1079_s30   ;;  %s849_s10 = sadd.s32 4294967294, %s1079_s30   ;;  %s1079_s30 = sphi %s1135_s30, %s1289_s30   ;;  %s1075_s29 = sphi %s1133_s29, %s1288_s29   ;;  %s1071_s28 = sphi %s1131_s28, %s1287_s28   ;;  %s1067_s27 = sphi %s1129_s27, %s1286_s27  }
   0x4   : > { %s1154_s11 = sadd.s32 1, %s1079_s30   ;;  %s216_s12 = sadd.s32 1, %s1075_s29 }
   0x5   : > { %s213_s13 = ssub.s32 %s1079_s30, %s1154_s11  ;;  %p226_p0 = scmp.ne.s32.totalorder %s1075_s29, %s1071_s28 }
   0x6   : > { %p214_p1 = scmp.eq.s32.totalorder %s213_s13, 0  ;;  %p227_p2 = scmp.eq.s32.totalorder %s1150_s9, 1 }
   0x7   : > { %p232_p3 = scmp.ne.s32.totalorder %s1071_s28, %s1067_s27  ;;  %p233_p4 = scmp.eq.s32.totalorder %s849_s10, 1 }
   0x8   : > { %s1165_s14 = scalar_select %p214_p1, %s1075_s29, %s216_s12  }
   0x9   : > { %p1167_p5 = por %p227_p2, %p226_p0  ;;  %p1171_p6 = por %p233_p4, %p232_p3 }
   0xa   : > { %p852_p7 = scmp.ge.s32.totalorder %s1079_s30, 1  ;;  %p293_p8 = scmp.lt.s32.totalorder %s1079_s30, 3 }
   0xc   : > { %p294_p9 = pnand %p852_p7, %p293_p8 }
   0xd   : > { %v985_v0 = vld [vmem:[%s1280_s5] sm:$0xff] (!%p294_p9)   ;;  %s853_s19 = sshll.u32 (!%p294_p9), %s1150_s9, 3  ;;  %v986_v1 = vld [vmem:[%s1280_s5 + $0x8] sm:$0xff] (!%p294_p9)   ;;  %vm412_vm0 = vcmask (!%p294_p9), 261120   ;;  %v1081_v12 = vmov (!%p294_p9), 0.0   ;;  %vm1082_vm1 = vmmov (!%p294_p9), 0  }
   0xe   : > { %297 = sbr.rel (%p294_p9) target bundleno = 587 (0x24b), region = 52  ;;  %p338_p10 = scmp.lt.s32.totalorder (!%p294_p9), %s853_s19, 15  ;;  %900 = vmatprep.subr.bf16.mxu0 (!%p294_p9), %v985_v0  ;;  %v989_v2 = vld [vmem:[%s1279_s4] sm:$0xff] (!%p294_p9)   ;;  %v992_v3 = vld [vmem:[%s1279_s4 + $0x8] sm:$0xff] (!%p294_p9)   ;;  %924 = vmatprep.subr.bf16.mxu1 (!%p294_p9), %v1081_v12  ;;  %vm723_vm3 = vcmask (!%p294_p9), 519168   ;;  %vm749_vm5 = vcmask (!%p294_p9), 516096  }
   0xf   : > { %901 = vmatpush3.bf16.msra.mxu0 (!%p294_p9), %v985_v0  ;;  %932 = vmatprep.mubr.msk.bf16.mxu1 (!%p294_p9), %vm1082_vm1, %v1081_v12  ;;  %v877_v13 = vld [vmem:[%s1281_s6] ss:$0 sm:$0xff] (!%p294_p9)  ;;  %p349_p11 = scmp.lt.s32.totalorder (!%p294_p9), %s1150_s9, 1  ;;  %s335_s18 = sand.u32 (!%p294_p9), 1, %s1071_s28  }
  0x10   : > { %902 = vmatprep.subr.bf16.mxu0 (!%p294_p9), %v986_v1  ;;  %s336_s20 = scalar_lea.vmem (!%p294_p9), [#allocation2], %s335_s18  ;;  %s752_s25 = scalar_lea.sflag (!%p294_p9), [#allocation3], %s335_s18 }
  0x11   : > { %s764_s21 = sshll.u32 (!%p294_p9), %s336_s20, 4  ;;  %s1083_s26 = smov (!%p294_p9), [#allocation2]   ;;  %s1235_s21 = int_to_ptr.vmem [resolvable:$true] %s764_s21 }
  0x13   : > { %903 = vmatpush3.bf16.msra.mxu0 (!%p294_p9), %v986_v1 }
  0x14   : > { %912 = vmatprep.subr.bf16.mxu0 (!%p294_p9), %v989_v2 }
  0x15   : > { %s1291_s19 = smov (!%p338_p10, %s853_s19), 15 }
  0x16   : > { %s854_s24 = sshll.u32 %s1291_s19, 2 }
  0x17   : > { %s347_s10 = scalar_lea.vmem %s1276_s1, %s854_s24  ;;  %s341_s19 = scalar_lea.vmem %s1275_s0, %s854_s24 }
  0x18   : > { %v987_v4 = vld [vmem:[%s347_s10] sm:$0xff]   ;;  %v988_v5 = vld [vmem:[%s347_s10 + $0x8] sm:$0xff]   ;;  %v990_v6 = vld [vmem:[%s347_s10 + $0x10] sm:$0xff]   ;;  %s350_s24 = scalar_select %p349_p11, %s1150_s9, 1 }
  0x19   : > { %904 = vmatprep.mubr.msk.bf16.mxu0 %vm412_vm0, %v987_v4  ;;  %v991_v7 = vld [vmem:[%s347_s10 + $0x18] sm:$0xff]   ;;  %v993_v8 = vld [vmem:[%s341_s19] sm:$0xff]   ;;  %v994_v9 = vld [vmem:[%s341_s19 + $0x8] sm:$0xff]  }
  0x1a   : > { %905 = vmatmul.mubr.msk.bf16.vlgmr.msra.gmra.mrb[0].mxu0 %vm412_vm0, %v988_v5  ;;  %v995_v10 = vld [vmem:[%s341_s19 + $0x10] sm:$0xff]   ;;  %v996_v11 = vld [vmem:[%s341_s19 + $0x18] sm:$0xff]   ;;  %s351_s10 = scalar_lea.vmem %s1277_s2, %s350_s24  ;;  %s354_s17 = scalar_lea.vmem %s1278_s3, %s350_s24 }
  0x1b   : > { %913 = vmatpush3.bf16.msra.mxu0 %v989_v2  ;;  %908 = vmatprep.mubr.msk.bf16.mxu0 %vm412_vm0, %v990_v6  ;;  %s880_s19 = sshll.u32 %s1150_s9, 4  ;;  %s1017_s9 = scalar_lea.vmem %s1235_s21, 16 }
  0x1c   : > { %914 = vmatprep.subr.bf16.mxu0 %v992_v3  ;;  %s1233_s24 = scalar_lea.hbm %s1283_s8, %s880_s19  ;;  %p1018_p12 = scmp.ne.s32.totalorder %s1235_s21, %s1017_s9 }
  0x1e   : > { %p1019_p13 = pnand %p1018_p12, %p1167_p5 }
  0x1f   : > { %915 = vmatpush3.bf16.msra.mxu0 %v992_v3 }
  0x20   : > { %p1020_p0 = pneg %p1019_p13 }
  0x22   : > { %909 = vmatmul.mubr.msk.bf16.gmra.mrb[4].mxu0 %vm412_vm0, %v991_v7 }
  0x23   : > { %916 = vmatprep.mubr.msk.bf16.mxu0 %vm412_vm0, %v993_v8 }
  0x2a   : > { %917 = vmatmul.mubr.msk.bf16.vlgmr.msra.gmra.mrb[0].mxu0 %vm412_vm0, %v994_v9 }
  0x2b   : > { %920 = vmatprep.mubr.msk.bf16.mxu0 %vm412_vm0, %v995_v10 }
  0x32   : > { %921 = vmatmul.mubr.msk.bf16.gmra.mrb[4].mxu0 %vm412_vm0, %v996_v11 }
  0xfd   : > { %v918_v14 = vpop.f32.mrb[0].mxu0 }
  0xfe   : > { %v608_v15 = vadd.f32 %v918_v14, %v877_v13  ;;  %v568_v16 = vpop.f32.mrb[1].mxu0 }
  0xff   : > { %v606_v17 = vadd.f32 %v877_v13, %v568_v16  ;;  %v919_v18 = vpop.f32.mrb[2].mxu0  ;;  %v715_v16 = vlaneseq }
 0x100   : > { %v624_v19 = vmul.f32 0.70710677, %v608_v15  ;;  %v609_v20 = vadd.f32 %v919_v18, %v877_v13  ;;  %v571_v21 = vpop.f32.mrb[3].mxu0  ;;  %v616_v44 = vmul.f32 0.5, %v608_v15  ;;  %v654_v15 = vld [vmem:[%s1282_s7] sm:$0x3] }
 0x101   : > { %v622_v22 = vmul.f32 0.70710677, %v606_v17  ;;  %v607_v23 = vadd.f32 %v877_v13, %v571_v21  ;;  %v614_v47 = vmul.f32 0.5, %v606_v17  ;;  %v716_v17 = vshrl.u32 %v715_v16, 7  ;;  %v879_v18 = vld [vmem:[%s351_s10] ss:$0 sm:$0xff] }
 0x102   : > { %997 = verf.f32 %v624_v19  ;;  %v625_v24 = vmul.f32 0.70710677, %v609_v20  ;;  %v617_v45 = vmul.f32 0.5, %v609_v20  ;;  %s1021_s10 = sshll.u32 %s1083_s26, 4  ;;  %s1022_s10 = int_to_ptr.vmem [resolvable:$false] %s1021_s10 }
 0x103   : > { %999 = verf.f32 %v622_v22  ;;  %v623_v25 = vmul.f32 0.70710677, %v607_v23  ;;  %v615_v48 = vmul.f32 0.5, %v607_v23  ;;  %vm721_vm2 = vcmp.eq.s32.totalorder %v716_v17, %v879_v18  ;;  %s1023_s12 = scalar_lea.vmem %s1022_s10, 32  ;;  %p1024_p1 = scmp.lt.s32.totalorder %s1235_s21, %s1022_s10 }
 0x104   : > { %1001 = verf.f32 %v625_v24  ;;  %p1025_p2 = scmp.lt.s32.totalorder %s1023_s12, %s1017_s9 }
 0x105   : > { %1003 = verf.f32 %v623_v25  ;;  %v922_v26 = vpop.f32.mrb[4].mxu0 }
 0x106   : > { %v612_v27 = vadd.f32 %v922_v26, %v877_v13  ;;  %v584_v28 = vpop.f32.mrb[5].mxu0  ;;  %p1026_p3 = por %p1025_p2, %p1024_p1 }
 0x107   : > { %v610_v29 = vadd.f32 %v877_v13, %v584_v28  ;;  %v923_v30 = vpop.f32.mrb[6].mxu0 }
 0x108   : > { %v628_v31 = vmul.f32 0.70710677, %v612_v27  ;;  %v613_v32 = vadd.f32 %v923_v30, %v877_v13  ;;  %v587_v33 = vpop.f32.mrb[7].mxu0  ;;  %v620_v63 = vmul.f32 0.5, %v612_v27  ;;  %p1027_p4 = pnand %p1026_p3, %p1020_p0 }
 0x109   : > { %v626_v34 = vmul.f32 0.70710677, %v610_v29  ;;  %v611_v35 = vadd.f32 %v877_v13, %v587_v33  ;;  %v618_v2 = vmul.f32 0.5, %v610_v29  ;;  %v731_v29 = vld [vmem:[%s354_s17] sm:$0x1] }
 0x10a   : > { %1005 = verf.f32 %v628_v31  ;;  %v629_v36 = vmul.f32 0.70710677, %v613_v32  ;;  %v621_v0 = vmul.f32 0.5, %v613_v32 }
 0x10b   : > { %1007 = verf.f32 %v626_v34  ;;  %v627_v37 = vmul.f32 0.70710677, %v611_v35  ;;  %v619_v3 = vmul.f32 0.5, %v611_v35 }
 0x10c   : > { %v998_v38 = vpop.eup %997  ;;  %1009 = verf.f32 %v629_v36 }
 0x10d   : > { %v1000_v39 = vpop.eup %999  ;;  %v640_v40 = vadd.f32 1.0, %v998_v38  ;;  %1011 = verf.f32 %v627_v37 }
 0x10e   : > { %v1002_v41 = vpop.eup %1001  ;;  %v638_v42 = vadd.f32 1.0, %v1000_v39 }
 0x10f   : > { %v1004_v43 = vpop.eup %1003  ;;  %v641_v46 = vadd.f32 1.0, %v1002_v41  ;;  %v648_v50 = vmul.f32 %v640_v40, %v616_v44 }
 0x110   : > { %v639_v49 = vadd.f32 1.0, %v1004_v43  ;;  %v646_v52 = vmul.f32 %v638_v42, %v614_v47 }
 0x111   : > { %v649_v51 = vmul.f32 %v641_v46, %v617_v45 }
 0x112   : > { %v647_v53 = vmul.f32 %v639_v49, %v615_v48 }
 0x113   : > { %v656_v54 = vpack.c.bf16 %v649_v51, %v648_v50 }
 0x114   : > { %v1006_v55 = vpop.eup %1005  ;;  %v655_v56 = vpack.c.bf16 %v647_v53, %v646_v52 }
 0x115   : > { %v1008_v57 = vpop.eup %1007  ;;  %v644_v58 = vadd.f32 1.0, %v1006_v55  ;;  %v666_v11 = vsel %vm412_vm0, %v656_v54, 0 }
 0x116   : > { %v1010_v59 = vpop.eup %1009  ;;  %v642_v60 = vadd.f32 1.0, %v1008_v57  ;;  %v663_v61 = vsel %vm412_vm0, %v655_v56, 0 }
 0x117   : > { %v1012_v62 = vpop.eup %1011  ;;  %v645_v1 = vadd.f32 1.0, %v1010_v59  ;;  %925 = vmatpush3.bf16.xpose.msra.mxu1 %v663_v61  ;;  %v652_v5 = vmul.f32 %v644_v58, %v620_v63 }
 0x118   : > { %v643_v4 = vadd.f32 1.0, %v1012_v62  ;;  %926 = vmatprep.subr.bf16.mxu1 %v1081_v12  ;;  %v650_v7 = vmul.f32 %v642_v60, %v618_v2 }
 0x119   : > { %v653_v6 = vmul.f32 %v645_v1, %v621_v0 }
 0x11a   : > { %v651_v8 = vmul.f32 %v643_v4, %v619_v3 }
 0x11b   : > { %v658_v9 = vpack.c.bf16 %v653_v6, %v652_v5 }
 0x11c   : > { %v657_v10 = vpack.c.bf16 %v651_v8, %v650_v7 }
 0x11d   : > { %v672_v14 = vsel %vm412_vm0, %v658_v9, 0 }
 0x11e   : > { %v669_v13 = vsel %vm412_vm0, %v657_v10, 0 }
 0x11f   : > { %927 = vmatpush3.bf16.xpose.msra.mxu1 %v666_v11 }
 0x120   : > { %928 = vmatprep.subr.bf16.mxu1 %v1081_v12 }
 0x127   : > { %929 = vmatpush3.bf16.xpose.msra.mxu1 %v669_v13 }
 0x128   : > { %930 = vmatprep.subr.bf16.mxu1 %v1081_v12 }
 0x12f   : > { %931 = vmatpush3.bf16.xpose.msra.mxu1 %v672_v14 }
 0x136   : > { %933 = vmatmul.mubr.msk.bf16.vlgmr.msra.gmra.mrb[0].mxu1 %vm412_vm0, %v654_v15 }
 0x209   : > { %v708_v12 = vpop.f32.mrb[0].mxu1 }
 0x20a   : > { %v722_v19 = vsel %vm721_vm2, %v708_v12, 0.0  ;;  %v934_v20 = vpop.f32.mrb[1].mxu1 }
 0x20b   : > { %v724_v21 = vsel %vm723_vm3, %v722_v19, 0.0  ;;  %v711_v22 = vpop.f32.mrb[2].mxu1 }
 0x20c   : > { %v725_v23 = vrot.slane %v724_v21, 4  ;;  %v935_v24 = vpop.f32.mrb[3].mxu1 }
 0x20e   : > { %v726_v25 = vadd.f32 %v725_v23, %v724_v21 }
 0x210   : > { %v727_v26 = vrot.slane %v726_v25, 2 }
 0x212   : > { %v728_v27 = vadd.f32 %v727_v26, %v726_v25 }
 0x214   : > { %v729_v28 = vrot.slane %v728_v27, 1 }
 0x216   : > { %v730_v30 = vadd.f32 %v729_v28, %v728_v27 }
 0x218   : > { %v732_v31 = vmul.f32 %v731_v29, %v730_v30 }
 0x21a   : > { %v735_v32 = vand.u32 2147483647, %v732_v31  ;;  %v733_v39 = vsub.f32 0.0, %v732_v31 }
 0x21c   : > { %v736_v33 = vsub.f32 0.0, %v735_v32  ;;  %v734_v44 = vmax.f32 %v733_v39, 0.0 }
 0x21e   : > { %v737_v34 = vmul.f32 1.442695, %v736_v33 }
 0x220   : > { %1013 = vpow2.f32 %v737_v34 }
 0x22a   : > { %v1014_v35 = vpop.eup %1013 }
 0x22b   : > { %v739_v36 = vadd.f32 1.0, %v1014_v35  ;;  %v742_v37 = vmul.f32 -0.5, %v1014_v35  ;;  %v745_v40 = vand.u32 2147483647, %v1014_v35 }
 0x22d   : > { %1015 = vlog2.f32 %v739_v36  ;;  %v743_v38 = vadd.f32 1.0, %v742_v37  ;;  %vm746_vm4 = vcmp.lt.f32.partialorder %v745_v40, 0.0004427343 }
 0x22f   : > { %v744_v43 = vmul.f32 %v1014_v35, %v743_v38 }
 0x237   : > { %v1016_v41 = vpop.eup %1015 }
 0x238   : > { %v741_v42 = vmul.f32 0.6931472, %v1016_v41 }
 0x23a   : > { %v747_v45 = vsel %vm746_vm4, %v744_v43, %v741_v42 }
 0x23b   : > { %v748_v46 = vadd.f32 %v747_v45, %v734_v44 }
 0x23d   : > { %750 = vst.msk [vmem:[%s336_s20] sm:$0x1] %vm749_vm5, %v748_v46 }
 0x23e   : > { %1030 = shalt.err (!%p1027_p4)
}
 0x23f   : > { %s1031_s13 = scalar_lea.hbm %s1233_s24, 16  ;;  %s1035_s19 = scalar_lea.hbm %s1283_s8, 32 }
 0x240   : > { %p1032_p7 = scmp.ne.s32.totalorder %s1233_s24, %s1031_s13  ;;  %p1036_p10 = scmp.lt.u32.totalorder %s1233_s24, %s1283_s8 }
 0x241   : > { %p1037_p11 = scmp.lt.u32.totalorder %s1035_s19, %s1031_s13  ;;  %p1039_p13 = scmp.lt.u32.totalorder %s1031_s13, %s1233_s24 }
 0x242   : > { %p1033_p8 = pnand %p1032_p7, %p1167_p5 }
 0x243   : > { %p1038_p12 = por %p1037_p11, %p1036_p10 }
 0x244   : > { %p1034_p9 = pneg %p1033_p8 }
 0x245   : > { %p1040_p0 = por %p1039_p13, %p1038_p12 }
 0x247   : > { %p1041_p1 = pnand %p1040_p0, %p1034_p9 }
 0x249   : > { %1044 = shalt.err (!%p1041_p1)
}
 0x24a   : > { %944 = dma.vmem_to_hbm [thread:$0]  (%p1167_p5), %s1235_s21, 16, %s1233_s24, %s752_s25  }
 0x24b PF: > { %p950_p2 = scmp.ge.s32.totalorder %s1079_s30, 2  ;;  %s776_s23 = sand.u32 1, %s1067_s27  }
 0x24c   : > { %s777_s9 = scalar_lea.sflag [#allocation3], %s776_s23 }
 0x24d   : > { %p947_p3 = pnand %p950_p2, %p1171_p6 }
 0x24f   : > { %1062 = dma.done.wait (!%p947_p3), %s777_s9, 16  }
 0x250   : > { %1064 = vsyncadd (!%p947_p3), %s777_s9, 4294967280  ;;  %p18_p4 = scmp.ge.s32.totalorder %s1154_s11, 4   ;;  %s1286_s27 = smov %s1071_s28 }
 0x251   : > { %s1287_s28 = smov %s1075_s29  ;;  %s1288_s29 = smov %s1165_s14 }
 0x252   : > { %s1289_s30 = smov %s1154_s11  ;;  %20 = sbr.rel (!%p18_p4) target bundleno = 3 (0x3), region = 96 }
 0x259   :  { %781 = vsyncpa [#allocation3], 1 }
 0x25a   :  { %783 = vsyncpa [#allocation3 + $0x1], 1 }

// kernel: tpu_custom_call.1
= control target key start
LH: loop header
LB: loop body
LE: loop exit
PB: predicated region body
PF: predicated region fallthrough
CT: control target
= control target key end

     0   :  { %13 = vsyncpa [#allocation3], 0  ;;  %s1275_s0 = inlined_call_operand.vmem [shape: bf16[128,32], index: 0, kind: input, shape index: {}]   ;;  %s1276_s1 = inlined_call_operand.vmem [shape: bf16[128,32], index: 1, kind: input, shape index: {}]   ;;  %s1277_s2 = inlined_call_operand.vmem [shape: s32[2,1,64], index: 2, kind: input, shape index: {}]   ;;  %s1278_s3 = inlined_call_operand.vmem [shape: f32[2,1,64], index: 3, kind: input, shape index: {}]   ;;  %s1279_s4 = inlined_call_operand.vmem [shape: bf16[32,32], index: 4, kind: input, shape index: {}]   ;;  %s1280_s5 = inlined_call_operand.vmem [shape: bf16[32,32], index: 5, kind: input, shape index: {}]   ;;  %s1281_s6 = inlined_call_operand.vmem [shape: f32[1,32], index: 6, kind: input, shape index: {}]   ;;  %s1282_s7 = inlined_call_operand.vmem [shape: bf16[4,32], index: 7, kind: input, shape index: {}]   ;;  %s1283_s8 = inlined_call_operand.hbm [shape: f32[2,1,64], index: 8, kind: output, shape index: {}]  }
   0x1   :  { %15 = vsyncpa [#allocation3 + $0x1], 0  ;;  %s1129_s27 = smov 0   ;;  %s1131_s28 = smov 0  }
   0x2   :  { %s1133_s29 = smov 0   ;;  %s1135_s30 = smov 0  }
   0x3 LB: > { %s1150_s9 = sadd.s32 4294967295, %s1079_s30   ;;  %s849_s10 = sadd.s32 4294967294, %s1079_s30   ;;  %s1079_s30 = sphi %s1135_s30, %s1289_s30   ;;  %s1075_s29 = sphi %s1133_s29, %s1288_s29   ;;  %s1071_s28 = sphi %s1131_s28, %s1287_s28   ;;  %s1067_s27 = sphi %s1129_s27, %s1286_s27  }
   0x4   : > { %s1154_s11 = sadd.s32 1, %s1079_s30   ;;  %s216_s12 = sadd.s32 1, %s1075_s29 }
   0x5   : > { %s213_s13 = ssub.s32 %s1079_s30, %s1154_s11  ;;  %p226_p0 = scmp.ne.s32.totalorder %s1075_s29, %s1071_s28 }
   0x6   : > { %p214_p1 = scmp.eq.s32.totalorder %s213_s13, 0  ;;  %p227_p2 = scmp.eq.s32.totalorder %s1150_s9, 1 }
   0x7   : > { %p232_p3 = scmp.ne.s32.totalorder %s1071_s28, %s1067_s27  ;;  %p233_p4 = scmp.eq.s32.totalorder %s849_s10, 1 }
   0x8   : > { %s1165_s14 = scalar_select %p214_p1, %s1075_s29, %s216_s12  }
   0x9   : > { %p1167_p5 = por %p227_p2, %p226_p0  ;;  %p1171_p6 = por %p233_p4, %p232_p3 }
   0xa   : > { %p852_p7 = scmp.ge.s32.totalorder %s1079_s30, 1  ;;  %p293_p8 = scmp.lt.s32.totalorder %s1079_s30, 3 }
   0xc   : > { %p294_p9 = pnand %p852_p7, %p293_p8 }
   0xd   : > { %v985_v0 = vld [vmem:[%s1280_s5] sm:$0xff] (!%p294_p9)   ;;  %s853_s19 = sshll.u32 (!%p294_p9), %s1150_s9, 3  ;;  %v986_v1 = vld [vmem:[%s1280_s5 + $0x8] sm:$0xff] (!%p294_p9)   ;;  %vm412_vm0 = vcmask (!%p294_p9), 261120   ;;  %v1081_v12 = vmov (!%p294_p9), 0.0   ;;  %vm1082_vm1 = vmmov (!%p294_p9), 0  }
   0xe   : > { %297 = sbr.rel (%p294_p9) target bundleno = 587 (0x24b), region = 52  ;;  %p338_p10 = scmp.lt.s32.totalorder (!%p294_p9), %s853_s19, 15  ;;  %900 = vmatprep.subr.bf16.mxu0 (!%p294_p9), %v985_v0  ;;  %v989_v2 = vld [vmem:[%s1279_s4] sm:$0xff] (!%p294_p9)   ;;  %v992_v3 = vld [vmem:[%s1279_s4 + $0x8] sm:$0xff] (!%p294_p9)   ;;  %924 = vmatprep.subr.bf16.mxu1 (!%p294_p9), %v1081_v12  ;;  %vm723_vm3 = vcmask (!%p294_p9), 519168   ;;  %vm749_vm5 = vcmask (!%p294_p9), 516096  }
   0xf   : > { %901 = vmatpush3.bf16.msra.mxu0 (!%p294_p9), %v985_v0  ;;  %932 = vmatprep.mubr.msk.bf16.mxu1 (!%p294_p9), %vm1082_vm1, %v1081_v12  ;;  %v877_v13 = vld [vmem:[%s1281_s6] ss:$0 sm:$0xff] (!%p294_p9)  ;;  %p349_p11 = scmp.lt.s32.totalorder (!%p294_p9), %s1150_s9, 1  ;;  %s335_s18 = sand.u32 (!%p294_p9), 1, %s1071_s28  }
  0x10   : > { %902 = vmatprep.subr.bf16.mxu0 (!%p294_p9), %v986_v1  ;;  %s336_s20 = scalar_lea.vmem (!%p294_p9), [#allocation2], %s335_s18  ;;  %s752_s25 = scalar_lea.sflag (!%p294_p9), [#allocation3], %s335_s18 }
  0x11   : > { %s764_s21 = sshll.u32 (!%p294_p9), %s336_s20, 4  ;;  %s1083_s26 = smov (!%p294_p9), [#allocation2]   ;;  %s1235_s21 = int_to_ptr.vmem [resolvable:$true] %s764_s21 }
  0x13   : > { %903 = vmatpush3.bf16.msra.mxu0 (!%p294_p9), %v986_v1 }
  0x14   : > { %912 = vmatprep.subr.bf16.mxu0 (!%p294_p9), %v989_v2 }
  0x15   : > { %s1291_s19 = smov (!%p338_p10, %s853_s19), 15 }
  0x16   : > { %s854_s24 = sshll.u32 %s1291_s19, 2 }
  0x17   : > { %s347_s10 = scalar_lea.vmem %s1276_s1, %s854_s24  ;;  %s341_s19 = scalar_lea.vmem %s1275_s0, %s854_s24 }
  0x18   : > { %v987_v4 = vld [vmem:[%s347_s10] sm:$0xff]   ;;  %v988_v5 = vld [vmem:[%s347_s10 + $0x8] sm:$0xff]   ;;  %v990_v6 = vld [vmem:[%s347_s10 + $0x10] sm:$0xff]   ;;  %s350_s24 = scalar_select %p349_p11, %s1150_s9, 1 }
  0x19   : > { %904 = vmatprep.mubr.msk.bf16.mxu0 %vm412_vm0, %v987_v4  ;;  %v991_v7 = vld [vmem:[%s347_s10 + $0x18] sm:$0xff]   ;;  %v993_v8 = vld [vmem:[%s341_s19] sm:$0xff]   ;;  %v994_v9 = vld [vmem:[%s341_s19 + $0x8] sm:$0xff]  }
  0x1a   : > { %905 = vmatmul.mubr.msk.bf16.vlgmr.msra.gmra.mrb[0].mxu0 %vm412_vm0, %v988_v5  ;;  %v995_v10 = vld [vmem:[%s341_s19 + $0x10] sm:$0xff]   ;;  %v996_v11 = vld [vmem:[%s341_s19 + $0x18] sm:$0xff]   ;;  %s351_s10 = scalar_lea.vmem %s1277_s2, %s350_s24  ;;  %s354_s17 = scalar_lea.vmem %s1278_s3, %s350_s24 }
  0x1b   : > { %913 = vmatpush3.bf16.msra.mxu0 %v989_v2  ;;  %908 = vmatprep.mubr.msk.bf16.mxu0 %vm412_vm0, %v990_v6  ;;  %s880_s19 = sshll.u32 %s1150_s9, 4  ;;  %s1017_s9 = scalar_lea.vmem %s1235_s21, 16 }
  0x1c   : > { %914 = vmatprep.subr.bf16.mxu0 %v992_v3  ;;  %s1233_s24 = scalar_lea.hbm %s1283_s8, %s880_s19  ;;  %p1018_p12 = scmp.ne.s32.totalorder %s1235_s21, %s1017_s9 }
  0x1e   : > { %p1019_p13 = pnand %p1018_p12, %p1167_p5 }
  0x1f   : > { %915 = vmatpush3.bf16.msra.mxu0 %v992_v3 }
  0x20   : > { %p1020_p0 = pneg %p1019_p13 }
  0x22   : > { %909 = vmatmul.mubr.msk.bf16.gmra.mrb[4].mxu0 %vm412_vm0, %v991_v7 }
  0x23   : > { %916 = vmatprep.mubr.msk.bf16.mxu0 %vm412_vm0, %v993_v8 }
  0x2a   : > { %917 = vmatmul.mubr.msk.bf16.vlgmr.msra.gmra.mrb[0].mxu0 %vm412_vm0, %v994_v9 }
  0x2b   : > { %920 = vmatprep.mubr.msk.bf16.mxu0 %vm412_vm0, %v995_v10 }
  0x32   : > { %921 = vmatmul.mubr.msk.bf16.gmra.mrb[4].mxu0 %vm412_vm0, %v996_v11 }
  0xfd   : > { %v918_v14 = vpop.f32.mrb[0].mxu0 }
  0xfe   : > { %v608_v15 = vadd.f32 %v918_v14, %v877_v13  ;;  %v568_v16 = vpop.f32.mrb[1].mxu0 }
  0xff   : > { %v606_v17 = vadd.f32 %v877_v13, %v568_v16  ;;  %v919_v18 = vpop.f32.mrb[2].mxu0  ;;  %v715_v16 = vlaneseq }
 0x100   : > { %v624_v19 = vmul.f32 0.70710677, %v608_v15  ;;  %v609_v20 = vadd.f32 %v919_v18, %v877_v13  ;;  %v571_v21 = vpop.f32.mrb[3].mxu0  ;;  %v616_v44 = vmul.f32 0.5, %v608_v15  ;;  %v654_v15 = vld [vmem:[%s1282_s7] sm:$0x3] }
 0x101   : > { %v622_v22 = vmul.f32 0.70710677, %v606_v17  ;;  %v607_v23 = vadd.f32 %v877_v13, %v571_v21  ;;  %v614_v47 = vmul.f32 0.5, %v606_v17  ;;  %v716_v17 = vshrl.u32 %v715_v16, 7  ;;  %v879_v18 = vld [vmem:[%s351_s10] ss:$0 sm:$0xff] }
 0x102   : > { %997 = verf.f32 %v624_v19  ;;  %v625_v24 = vmul.f32 0.70710677, %v609_v20  ;;  %v617_v45 = vmul.f32 0.5, %v609_v20  ;;  %s1021_s10 = sshll.u32 %s1083_s26, 4  ;;  %s1022_s10 = int_to_ptr.vmem [resolvable:$false] %s1021_s10 }
 0x103   : > { %999 = verf.f32 %v622_v22  ;;  %v623_v25 = vmul.f32 0.70710677, %v607_v23  ;;  %v615_v48 = vmul.f32 0.5, %v607_v23  ;;  %vm721_vm2 = vcmp.eq.s32.totalorder %v716_v17, %v879_v18  ;;  %s1023_s12 = scalar_lea.vmem %s1022_s10, 32  ;;  %p1024_p1 = scmp.lt.s32.totalorder %s1235_s21, %s1022_s10 }
 0x104   : > { %1001 = verf.f32 %v625_v24  ;;  %p1025_p2 = scmp.lt.s32.totalorder %s1023_s12, %s1017_s9 }
 0x105   : > { %1003 = verf.f32 %v623_v25  ;;  %v922_v26 = vpop.f32.mrb[4].mxu0 }
 0x106   : > { %v612_v27 = vadd.f32 %v922_v26, %v877_v13  ;;  %v584_v28 = vpop.f32.mrb[5].mxu0  ;;  %p1026_p3 = por %p1025_p2, %p1024_p1 }
 0x107   : > { %v610_v29 = vadd.f32 %v877_v13, %v584_v28  ;;  %v923_v30 = vpop.f32.mrb[6].mxu0 }
 0x108   : > { %v628_v31 = vmul.f32 0.70710677, %v612_v27  ;;  %v613_v32 = vadd.f32 %v923_v30, %v877_v13  ;;  %v587_v33 = vpop.f32.mrb[7].mxu0  ;;  %v620_v63 = vmul.f32 0.5, %v612_v27  ;;  %p1027_p4 = pnand %p1026_p3, %p1020_p0 }
 0x109   : > { %v626_v34 = vmul.f32 0.70710677, %v610_v29  ;;  %v611_v35 = vadd.f32 %v877_v13, %v587_v33  ;;  %v618_v2 = vmul.f32 0.5, %v610_v29  ;;  %v731_v29 = vld [vmem:[%s354_s17] sm:$0x1] }
 0x10a   : > { %1005 = verf.f32 %v628_v31  ;;  %v629_v36 = vmul.f32 0.70710677, %v613_v32  ;;  %v621_v0 = vmul.f32 0.5, %v613_v32 }
 0x10b   : > { %1007 = verf.f32 %v626_v34  ;;  %v627_v37 = vmul.f32 0.70710677, %v611_v35  ;;  %v619_v3 = vmul.f32 0.5, %v611_v35 }
 0x10c   : > { %v998_v38 = vpop.eup %997  ;;  %1009 = verf.f32 %v629_v36 }
 0x10d   : > { %v1000_v39 = vpop.eup %999  ;;  %v640_v40 = vadd.f32 1.0, %v998_v38  ;;  %1011 = verf.f32 %v627_v37 }
 0x10e   : > { %v1002_v41 = vpop.eup %1001  ;;  %v638_v42 = vadd.f32 1.0, %v1000_v39 }
 0x10f   : > { %v1004_v43 = vpop.eup %1003  ;;  %v641_v46 = vadd.f32 1.0, %v1002_v41  ;;  %v648_v50 = vmul.f32 %v640_v40, %v616_v44 }
 0x110   : > { %v639_v49 = vadd.f32 1.0, %v1004_v43  ;;  %v646_v52 = vmul.f32 %v638_v42, %v614_v47 }
 0x111   : > { %v649_v51 = vmul.f32 %v641_v46, %v617_v45 }
 0x112   : > { %v647_v53 = vmul.f32 %v639_v49, %v615_v48 }
 0x113   : > { %v656_v54 = vpack.c.bf16 %v649_v51, %v648_v50 }
 0x114   : > { %v1006_v55 = vpop.eup %1005  ;;  %v655_v56 = vpack.c.bf16 %v647_v53, %v646_v52 }
 0x115   : > { %v1008_v57 = vpop.eup %1007  ;;  %v644_v58 = vadd.f32 1.0, %v1006_v55  ;;  %v666_v11 = vsel %vm412_vm0, %v656_v54, 0 }
 0x116   : > { %v1010_v59 = vpop.eup %1009  ;;  %v642_v60 = vadd.f32 1.0, %v1008_v57  ;;  %v663_v61 = vsel %vm412_vm0, %v655_v56, 0 }
 0x117   : > { %v1012_v62 = vpop.eup %1011  ;;  %v645_v1 = vadd.f32 1.0, %v1010_v59  ;;  %925 = vmatpush3.bf16.xpose.msra.mxu1 %v663_v61  ;;  %v652_v5 = vmul.f32 %v644_v58, %v620_v63 }
 0x118   : > { %v643_v4 = vadd.f32 1.0, %v1012_v62  ;;  %926 = vmatprep.subr.bf16.mxu1 %v1081_v12  ;;  %v650_v7 = vmul.f32 %v642_v60, %v618_v2 }
 0x119   : > { %v653_v6 = vmul.f32 %v645_v1, %v621_v0 }
 0x11a   : > { %v651_v8 = vmul.f32 %v643_v4, %v619_v3 }
 0x11b   : > { %v658_v9 = vpack.c.bf16 %v653_v6, %v652_v5 }
 0x11c   : > { %v657_v10 = vpack.c.bf16 %v651_v8, %v650_v7 }
 0x11d   : > { %v672_v14 = vsel %vm412_vm0, %v658_v9, 0 }
 0x11e   : > { %v669_v13 = vsel %vm412_vm0, %v657_v10, 0 }
 0x11f   : > { %927 = vmatpush3.bf16.xpose.msra.mxu1 %v666_v11 }
 0x120   : > { %928 = vmatprep.subr.bf16.mxu1 %v1081_v12 }
 0x127   : > { %929 = vmatpush3.bf16.xpose.msra.mxu1 %v669_v13 }
 0x128   : > { %930 = vmatprep.subr.bf16.mxu1 %v1081_v12 }
 0x12f   : > { %931 = vmatpush3.bf16.xpose.msra.mxu1 %v672_v14 }
 0x136   : > { %933 = vmatmul.mubr.msk.bf16.vlgmr.msra.gmra.mrb[0].mxu1 %vm412_vm0, %v654_v15 }
 0x209   : > { %v708_v12 = vpop.f32.mrb[0].mxu1 }
 0x20a   : > { %v722_v19 = vsel %vm721_vm2, %v708_v12, 0.0  ;;  %v934_v20 = vpop.f32.mrb[1].mxu1 }
 0x20b   : > { %v724_v21 = vsel %vm723_vm3, %v722_v19, 0.0  ;;  %v711_v22 = vpop.f32.mrb[2].mxu1 }
 0x20c   : > { %v725_v23 = vrot.slane %v724_v21, 4  ;;  %v935_v24 = vpop.f32.mrb[3].mxu1 }
 0x20e   : > { %v726_v25 = vadd.f32 %v725_v23, %v724_v21 }
 0x210   : > { %v727_v26 = vrot.slane %v726_v25, 2 }
 0x212   : > { %v728_v27 = vadd.f32 %v727_v26, %v726_v25 }
 0x214   : > { %v729_v28 = vrot.slane %v728_v27, 1 }
 0x216   : > { %v730_v30 = vadd.f32 %v729_v28, %v728_v27 }
 0x218   : > { %v732_v31 = vmul.f32 %v731_v29, %v730_v30 }
 0x21a   : > { %v735_v32 = vand.u32 2147483647, %v732_v31  ;;  %v733_v39 = vsub.f32 0.0, %v732_v31 }
 0x21c   : > { %v736_v33 = vsub.f32 0.0, %v735_v32  ;;  %v734_v44 = vmax.f32 %v733_v39, 0.0 }
 0x21e   : > { %v737_v34 = vmul.f32 1.442695, %v736_v33 }
 0x220   : > { %1013 = vpow2.f32 %v737_v34 }
 0x22a   : > { %v1014_v35 = vpop.eup %1013 }
 0x22b   : > { %v739_v36 = vadd.f32 1.0, %v1014_v35  ;;  %v742_v37 = vmul.f32 -0.5, %v1014_v35  ;;  %v745_v40 = vand.u32 2147483647, %v1014_v35 }
 0x22d   : > { %1015 = vlog2.f32 %v739_v36  ;;  %v743_v38 = vadd.f32 1.0, %v742_v37  ;;  %vm746_vm4 = vcmp.lt.f32.partialorder %v745_v40, 0.0004427343 }
 0x22f   : > { %v744_v43 = vmul.f32 %v1014_v35, %v743_v38 }
 0x237   : > { %v1016_v41 = vpop.eup %1015 }
 0x238   : > { %v741_v42 = vmul.f32 0.6931472, %v1016_v41 }
 0x23a   : > { %v747_v45 = vsel %vm746_vm4, %v744_v43, %v741_v42 }
 0x23b   : > { %v748_v46 = vadd.f32 %v747_v45, %v734_v44 }
 0x23d   : > { %750 = vst.msk [vmem:[%s336_s20] sm:$0x1] %vm749_vm5, %v748_v46 }
 0x23e   : > { %1030 = shalt.err (!%p1027_p4)
}
 0x23f   : > { %s1031_s13 = scalar_lea.hbm %s1233_s24, 16  ;;  %s1035_s19 = scalar_lea.hbm %s1283_s8, 32 }
 0x240   : > { %p1032_p7 = scmp.ne.s32.totalorder %s1233_s24, %s1031_s13  ;;  %p1036_p10 = scmp.lt.u32.totalorder %s1233_s24, %s1283_s8 }
 0x241   : > { %p1037_p11 = scmp.lt.u32.totalorder %s1035_s19, %s1031_s13  ;;  %p1039_p13 = scmp.lt.u32.totalorder %s1031_s13, %s1233_s24 }
 0x242   : > { %p1033_p8 = pnand %p1032_p7, %p1167_p5 }
 0x243   : > { %p1038_p12 = por %p1037_p11, %p1036_p10 }
 0x244   : > { %p1034_p9 = pneg %p1033_p8 }
 0x245   : > { %p1040_p0 = por %p1039_p13, %p1038_p12 }
 0x247   : > { %p1041_p1 = pnand %p1040_p0, %p1034_p9 }
 0x249   : > { %1044 = shalt.err (!%p1041_p1)
}
 0x24a   : > { %944 = dma.vmem_to_hbm [thread:$0]  (%p1167_p5), %s1235_s21, 16, %s1233_s24, %s752_s25  }
 0x24b PF: > { %p950_p2 = scmp.ge.s32.totalorder %s1079_s30, 2  ;;  %s776_s23 = sand.u32 1, %s1067_s27  }
 0x24c   : > { %s777_s9 = scalar_lea.sflag [#allocation3], %s776_s23 }
 0x24d   : > { %p947_p3 = pnand %p950_p2, %p1171_p6 }
 0x24f   : > { %1062 = dma.done.wait (!%p947_p3), %s777_s9, 16  }
 0x250   : > { %1064 = vsyncadd (!%p947_p3), %s777_s9, 4294967280  ;;  %p18_p4 = scmp.ge.s32.totalorder %s1154_s11, 4   ;;  %s1286_s27 = smov %s1071_s28 }
 0x251   : > { %s1287_s28 = smov %s1075_s29  ;;  %s1288_s29 = smov %s1165_s14 }
 0x252   : > { %s1289_s30 = smov %s1154_s11  ;;  %20 = sbr.rel (!%p18_p4) target bundleno = 3 (0x3), region = 96 }
 0x259   :  { %781 = vsyncpa [#allocation3], 1 }
 0x25a   :  { %783 = vsyncpa [#allocation3 + $0x1], 1 }

</bundles_post_ra>
